<compile_context>
chip_gen: v5e
topology: v5e:2x2
jax: 0.10.0
libtpu: 0.0.40
codegen_flags: <defaults>
</compile_context>

<pallas_src>
import functools

import jax
import jax.numpy as jnp
from jax.experimental import pallas as pl
from jax.experimental.pallas import tpu as pltpu

BN_EPS = 1e-5
_VMEM_LIMIT = 32 * 1024 * 1024  # safe on v5e/v6e/v7x; tiles here are only a few 100 KB


# ----------------------------- kernels -----------------------------

def _conv_stats_kernel(x_ref, w_ref, y_ref, stats_ref, *, channels_first_out):
    """3x3 conv (pad=1) on one row tile + per-tile partial BN statistics.

    x_ref     : [1, 1, TH+2, W+2, Cin]  bf16, zero-padded tile with 1-row halo
    w_ref     : [9*Cin, Cout]           bf16, HWIO weights reshaped (ky, kx, ci) major
    y_ref     : [1, 1, TH*W, Cout]      f32 (channels-last)   or
                [1, 1, Cout, TH*W]      f32 (channels-first, lane-dense stores)
    stats_ref : [1, 1, 2, Cout]         f32, row0 = sum, row1 = sum of squares
    """
    _, _, hp, wp, cin = x_ref.shape
    th, w = hp - 2, wp - 2

    x = x_ref[0, 0]                                    # (TH+2, W+2, Cin) bf16

    # im2col inside the tile: 9 shifted taps concatenated on the channel axis,
    # then ONE MXU dot with K = 9*Cin (instead of 9 small-K dots).
    taps = [x[ky:ky + th, kx:kx + w, :] for ky in range(3) for kx in range(3)]
    patches = jnp.concatenate(taps, axis=-1).reshape(th * w, 9 * cin)
    acc = jnp.dot(patches, w_ref[...], preferred_element_type=jnp.float32)  # (TH*W, Cout) f32

    # Partial BN statistics for this tile (finalized in the wrapper).
    s1 = jnp.sum(acc, axis=0, keepdims=True)           # (1, Cout)
    s2 = jnp.sum(acc * acc, axis=0, keepdims=True)     # (1, Cout)
    stats_ref[0, 0] = jnp.concatenate([s1, s2], axis=0)

    # NOTE: conv bias intentionally NOT added; it is cancelled by BN mean subtraction.
    if channels_first_out:
        y_ref[0, 0] = acc.T                            # (Cout, TH*W) lane-dense store
    else:
        y_ref[0, 0] = acc                              # (TH*W, Cout)


def _norm_relu_kernel(x_ref, scale_ref, shift_ref, o_ref):
    """Fused BN-affine + ReLU epilogue: y = max(x * scale + shift, 0)."""
    o_ref[0, 0] = jnp.maximum(x_ref[0, 0] * scale_ref[...] + shift_ref[...], 0.0)


# ----------------------------- wrapper -----------------------------

def _pick_row_tile(h, w, target_rows=128):
    """Largest divisor TH of H with TH*W <= target_rows (>= 1)."""
    best = 1
    for th in range(1, h + 1):
        if h % th == 0 and th * w <= max(target_rows, w):
            best = th
    return best


def _halo_row_tiles(xpad, th):
    """[N, H+2, W+2, C] -> [N, T, TH+2, W+2, C] (each tile carries its 1-row halo)."""
    n, hp, wp, c = xpad.shape
    t = (hp - 2) // th
    tiles = [xpad[:, i * th: i * th + th + 2] for i in range(t)]
    return jnp.stack(tiles, axis=1)


def _conv_bn_relu_stage(x_nhwc, w_hwio, gamma, beta, *, channels_first_out):
    """One (conv3x3 pad=1 -> BN(batch stats) -> ReLU) stage.

    Returns NHWC [N,H,W,Cout] if channels_first_out=False, else NCHW [N,Cout,H,W].
    """
    n, h, w, cin = x_nhwc.shape
    cout = w_hwio.shape[-1]
    th = _pick_row_tile(h, w)
    t = h // th
    m = th * w

    # --- wrapper-side layout plumbing (free-ish XLA ops) ---
    xpad = jnp.pad(x_nhwc, ((0, 0), (1, 1), (1, 1), (0, 0)))
    x_tiles = _halo_row_tiles(xpad, th).astype(jnp.bfloat16)      # [N,T,TH+2,W+2,Cin]
    w9 = w_hwio.reshape(9 * cin, cout).astype(jnp.bfloat16)       # (ky,kx,ci)-major

    conv_shape = (n, t, cout, m) if channels_first_out else (n, t, m, cout)
    conv_block = (1, 1, cout, m) if channels_first_out else (1, 1, m, cout)
    cparams = pltpu.CompilerParams(
        dimension_semantics=("parallel", "parallel"),
        vmem_limit_bytes=_VMEM_LIMIT)

    # --- pass A: tiled conv + partial BN stats ---
    conv_out, partial = pl.pallas_call(
        functools.partial(_conv_stats_kernel, channels_first_out=channels_first_out),
        out_shape=(jax.ShapeDtypeStruct(conv_shape, jnp.float32),
                   jax.ShapeDtypeStruct((n, t, 2, cout), jnp.float32)),
        grid=(n, t),
        in_specs=[
            pl.BlockSpec((1, 1, th + 2, w + 2, cin), lambda i, j: (i, j, 0, 0, 0)),
            pl.BlockSpec((9 * cin, cout), lambda i, j: (0, 0)),
        ],
        out_specs=(
            pl.BlockSpec(conv_block, lambda i, j: (i, j, 0, 0)),
            pl.BlockSpec((1, 1, 2, cout), lambda i, j: (i, j, 0, 0)),
        ),
        compiler_params=cparams,
    )(x_tiles, w9)

    # --- finalize BN statistics (O(T*Cout), negligible) and fold into one FMA ---
    s = jnp.sum(partial, axis=(0, 1))                 # (2, Cout)
    cnt = jnp.float32(n * h * w)
    mean = s[0] / cnt
    var = jnp.maximum(s[1] / cnt - mean * mean, 0.0)  # clamp: E[x^2]-mean^2 can go ~-0
    scale = gamma * jax.lax.rsqrt(var + BN_EPS)
    shift = beta - mean * scale
    if channels_first_out:
        scale2d, shift2d = scale.reshape(cout, 1), shift.reshape(cout, 1)
    else:
        scale2d, shift2d = scale.reshape(1, cout), shift.reshape(1, cout)

    # --- pass B: tiled normalize + ReLU ---
    y = pl.pallas_call(
        _norm_relu_kernel,
        out_shape=jax.ShapeDtypeStruct(conv_shape, jnp.float32),
        grid=(n, t),
        in_specs=[
            pl.BlockSpec(conv_block, lambda i, j: (i, j, 0, 0)),
            pl.BlockSpec(scale2d.shape, lambda i, j: (0, 0)),
            pl.BlockSpec(shift2d.shape, lambda i, j: (0, 0)),
        ],
        out_specs=pl.BlockSpec(conv_block, lambda i, j: (i, j, 0, 0)),
        compiler_params=cparams,
    )(conv_out, scale2d, shift2d)

    if channels_first_out:
        # [N,T,Cout,TH*W] -> NCHW [N,Cout,H,W]  (no extra transpose needed downstream)
        return y.reshape(n, t, cout, th, w).transpose(0, 2, 1, 3, 4).reshape(n, cout, h, w)
    # [N,T,TH*W,Cout] -> NHWC [N,H,W,Cout]  (pure reshape)
    return y.reshape(n, h, w, cout)


def x2conv_forward(x_nchw, params):
    """Forward pass of X2Conv. Input and output in NCHW (PyTorch convention)."""
    x = jnp.transpose(x_nchw, (0, 2, 3, 1))           # NCHW -> NHWC (channels on lanes)
    y1 = _conv_bn_relu_stage(x, params["w1"], params["g1"], params["beta1"],
                             channels_first_out=False)
    y2 = _conv_bn_relu_stage(y1, params["w2"], params["g2"], params["beta2"],
                             channels_first_out=True)  # emits NCHW directly
    return y2


# -------------------- pure-JAX reference (correctness check) --------------------

def _ref_stage(x_nhwc, w, b, gamma, beta):
    y = jax.lax.conv_general_dilated(
        x_nhwc, w, window_strides=(1, 1), padding="SAME",
        dimension_numbers=("NHWC", "HWIO", "NHWC"))
    y = y + b[None, None, None, :]                    # bias kept here on purpose
    mean = jnp.mean(y, axis=(0, 1, 2))
    var = jnp.mean((y - mean[None, None, None, :]) ** 2, axis=(0, 1, 2))
    y = (y - mean) * jax.lax.rsqrt(var + BN_EPS) * gamma + beta
    return jnp.maximum(y, 0.0)


def x2conv_reference(x_nchw, p):
    x = jnp.transpose(x_nchw, (0, 2, 3, 1))
    x = _ref_stage(x, p["w1"], p["b1"], p["g1"], p["beta1"])
    x = _ref_stage(x, p["w2"], p["b2"], p["g2"], p["beta2"])
    return jnp.transpose(x, (0, 3, 1, 2))


def init_params(key, in_ch, out_ch):
    ks = jax.random.split(key, 6)
    fan1, fan2 = in_ch * 9, out_ch * 9
    return {
        # conv weights stored HWIO (3, 3, Cin, Cout); deterministic synthetic init.
        "w1": jax.random.normal(ks[0], (3, 3, in_ch, out_ch), jnp.float32) / jnp.sqrt(fan1),
        "b1": 0.05 * jax.random.normal(ks[1], (out_ch,), jnp.float32),
        "g1": 1.0 + 0.1 * jax.random.normal(ks[2], (out_ch,), jnp.float32),
        "beta1": 0.1 * jax.random.normal(ks[3], (out_ch,), jnp.float32),
        "w2": jax.random.normal(ks[4], (3, 3, out_ch, out_ch), jnp.float32) / jnp.sqrt(fan2),
        "b2": 0.05 * jax.random.normal(ks[5], (out_ch,), jnp.float32),
        "g2": jnp.ones((out_ch,), jnp.float32),
        "beta2": jnp.zeros((out_ch,), jnp.float32),
    }


if __name__ == "__main__":
    key = jax.random.PRNGKey(0)
    k_x, k_p = jax.random.split(key)

    N, in_ch, out_ch, H, W = 2, 4, 8, 16, 16
    x = jax.random.normal(k_x, (N, in_ch, H, W), jnp.float32)  # NCHW like PyTorch
    params = init_params(k_p, in_ch, out_ch)

    out = jax.block_until_ready(x2conv_forward(x, params))
    ref = jax.block_until_ready(x2conv_reference(x, params))

    assert out.shape == (N, out_ch, H, W), out.shape
    # bf16 MXU operands (f32 accumulation) -> ~0.3% relative error vs the f32 reference.
    assert jnp.allclose(out, ref, atol=2e-2, rtol=2e-2), float(jnp.max(jnp.abs(out - ref)))

    print("KERNEL_OK")
</pallas_src>

<mosaic_0001>
module attributes {stable_mosaic.version = 11 : i64} {
  func.func @_conv_stats_kernel(%arg0: i32, %arg1: i32, %arg2: memref<1x1x10x18x4xbf16, #tpu.memory_space<vmem>>, %arg3: memref<36x8xbf16, #tpu.memory_space<vmem>>, %arg4: memref<1x1x128x8xf32, #tpu.memory_space<vmem>>, %arg5: memref<1x1x2x8xf32, #tpu.memory_space<vmem>>) attributes {dimension_semantics = [#tpu.dimension_semantics<parallel>, #tpu.dimension_semantics<parallel>], iteration_bounds = array<i64: 2, 2>, scalar_prefetch = 0 : i64, scratch_operands = 0 : i64, tpu.core_type = #tpu.core_type<tc>, window_params = [{transform_indices = @transform_0, window_bounds = array<i64: 1, 1, 10, 18, 4>}, {pipeline_mode = #tpu.pipeline_mode<synchronous>, transform_indices = @transform_1, window_bounds = array<i64: 36, 8>}, {transform_indices = @transform_2, window_bounds = array<i64: 1, 1, 128, 8>}, {transform_indices = @transform_3, window_bounds = array<i64: 1, 1, 2, 8>}]} {
    %c0 = arith.constant 0 : index
    %c0_0 = arith.constant 0 : index
    %c0_1 = arith.constant 0 : index
    %c0_2 = arith.constant 0 : index
    %c0_3 = arith.constant 0 : index
    %0 = vector.load %arg2[%c0, %c0_0, %c0_1, %c0_2, %c0_3] : memref<1x1x10x18x4xbf16, #tpu.memory_space<vmem>>, vector<1x1x10x18x4xbf16>
    %1 = vector.shape_cast %0 : vector<1x1x10x18x4xbf16> to vector<10x18x4xbf16>
    %2 = vector.extract_strided_slice %1 {offsets = [0, 0, 0], sizes = [8, 16, 4], strides = [1, 1, 1]} : vector<10x18x4xbf16> to vector<8x16x4xbf16>
    %3 = vector.extract_strided_slice %1 {offsets = [0, 1, 0], sizes = [8, 16, 4], strides = [1, 1, 1]} : vector<10x18x4xbf16> to vector<8x16x4xbf16>
    %4 = vector.extract_strided_slice %1 {offsets = [0, 2, 0], sizes = [8, 16, 4], strides = [1, 1, 1]} : vector<10x18x4xbf16> to vector<8x16x4xbf16>
    %5 = vector.extract_strided_slice %1 {offsets = [1, 0, 0], sizes = [8, 16, 4], strides = [1, 1, 1]} : vector<10x18x4xbf16> to vector<8x16x4xbf16>
    %6 = vector.extract_strided_slice %1 {offsets = [1, 1, 0], sizes = [8, 16, 4], strides = [1, 1, 1]} : vector<10x18x4xbf16> to vector<8x16x4xbf16>
    %7 = vector.extract_strided_slice %1 {offsets = [1, 2, 0], sizes = [8, 16, 4], strides = [1, 1, 1]} : vector<10x18x4xbf16> to vector<8x16x4xbf16>
    %8 = vector.extract_strided_slice %1 {offsets = [2, 0, 0], sizes = [8, 16, 4], strides = [1, 1, 1]} : vector<10x18x4xbf16> to vector<8x16x4xbf16>
    %9 = vector.extract_strided_slice %1 {offsets = [2, 1, 0], sizes = [8, 16, 4], strides = [1, 1, 1]} : vector<10x18x4xbf16> to vector<8x16x4xbf16>
    %10 = vector.extract_strided_slice %1 {offsets = [2, 2, 0], sizes = [8, 16, 4], strides = [1, 1, 1]} : vector<10x18x4xbf16> to vector<8x16x4xbf16>
    %11 = tpu.concatenate %2, %3, %4, %5, %6, %7, %8, %9, %10 in 2 : vector<8x16x4xbf16>, vector<8x16x4xbf16>, vector<8x16x4xbf16>, vector<8x16x4xbf16>, vector<8x16x4xbf16>, vector<8x16x4xbf16>, vector<8x16x4xbf16>, vector<8x16x4xbf16>, vector<8x16x4xbf16> -> vector<8x16x36xbf16>
    %12 = vector.shape_cast %11 : vector<8x16x36xbf16> to vector<128x36xbf16>
    %c0_4 = arith.constant 0 : index
    %c0_5 = arith.constant 0 : index
    %13 = vector.load %arg3[%c0_4, %c0_5] : memref<36x8xbf16, #tpu.memory_space<vmem>>, vector<36x8xbf16>
    %cst = arith.constant dense<0.000000e+00> : vector<128x8xf32>
    %14 = tpu.matmul %12, %13, %cst {dimension_numbers = #tpu.dot_dimension_numbers<[1], [0], [0], [1], [0, 0, 1, 1], [], []>} : vector<128x36xbf16>, vector<36x8xbf16>, vector<128x8xf32> -> vector<128x8xf32>
    %cst_6 = arith.constant dense<0.000000e+00> : vector<8xf32>
    %15 = vector.multi_reduction <add>, %14, %cst_6 [0] : vector<128x8xf32> to vector<8xf32>
    %16 = vector.shape_cast %15 : vector<8xf32> to vector<1x8xf32>
    %17 = arith.mulf %14, %14 : vector<128x8xf32>
    %cst_7 = arith.constant dense<0.000000e+00> : vector<8xf32>
    %18 = vector.multi_reduction <add>, %17, %cst_7 [0] : vector<128x8xf32> to vector<8xf32>
    %19 = vector.shape_cast %18 : vector<8xf32> to vector<1x8xf32>
    %20 = tpu.concatenate %16, %19 in 0 : vector<1x8xf32>, vector<1x8xf32> -> vector<2x8xf32>
    %c0_8 = arith.constant 0 : index
    %c0_9 = arith.constant 0 : index
    %c0_10 = arith.constant 0 : index
    %c0_11 = arith.constant 0 : index
    %21 = vector.load %arg5[%c0_8, %c0_9, %c0_10, %c0_11] : memref<1x1x2x8xf32, #tpu.memory_space<vmem>>, vector<1x1x2x8xf32>
    %22 = vector.shape_cast %21 : vector<1x1x2x8xf32> to vector<2x8xf32>
    %23 = vector.shape_cast %20 : vector<2x8xf32> to vector<1x1x2x8xf32>
    tpu.vector_store %arg5[%c0_8, %c0_9, %c0_10, %c0_11], %23 {strides = array<i32>} : memref<1x1x2x8xf32, #tpu.memory_space<vmem>>, vector<1x1x2x8xf32>,
    %c0_12 = arith.constant 0 : index
    %c0_13 = arith.constant 0 : index
    %c0_14 = arith.constant 0 : index
    %c0_15 = arith.constant 0 : index
    %24 = vector.load %arg4[%c0_12, %c0_13, %c0_14, %c0_15] : memref<1x1x128x8xf32, #tpu.memory_space<vmem>>, vector<1x1x128x8xf32>
    %25 = vector.shape_cast %24 : vector<1x1x128x8xf32> to vector<128x8xf32>
    %26 = vector.shape_cast %14 : vector<128x8xf32> to vector<1x1x128x8xf32>
    tpu.vector_store %arg4[%c0_12, %c0_13, %c0_14, %c0_15], %26 {strides = array<i32>} : memref<1x1x128x8xf32, #tpu.memory_space<vmem>>, vector<1x1x128x8xf32>,
    return
  }
  func.func @transform_0(%arg0: i32, %arg1: i32) -> (i32, i32, i32, i32, i32) {
    %c0_i32 = arith.constant 0 : i32
    %c0_i32_0 = arith.constant 0 : i32
    %c0_i32_1 = arith.constant 0 : i32
    %c0_i32_2 = arith.constant 0 : i32
    return %arg0, %arg1, %c0_i32, %c0_i32_0, %c0_i32_1 : i32, i32, i32, i32, i32
  }
  func.func @transform_1(%arg0: i32, %arg1: i32) -> (i32, i32) {
    %c0_i32 = arith.constant 0 : i32
    %c0_i32_0 = arith.constant 0 : i32
    %c0_i32_1 = arith.constant 0 : i32
    return %c0_i32, %c0_i32_0 : i32, i32
  }
  func.func @transform_2(%arg0: i32, %arg1: i32) -> (i32, i32, i32, i32) {
    %c0_i32 = arith.constant 0 : i32
    %c0_i32_0 = arith.constant 0 : i32
    %c0_i32_1 = arith.constant 0 : i32
    return %arg0, %arg1, %c0_i32, %c0_i32_0 : i32, i32, i32, i32
  }
  func.func @transform_3(%arg0: i32, %arg1: i32) -> (i32, i32, i32, i32) {
    %c0_i32 = arith.constant 0 : i32
    %c0_i32_0 = arith.constant 0 : i32
    %c0_i32_1 = arith.constant 0 : i32
    return %arg0, %arg1, %c0_i32, %c0_i32_0 : i32, i32, i32, i32
  }
}

</mosaic_0001>

<bundles_post_ra>
// kernel: tpu_custom_call.1
= control target key start
LH: loop header
LB: loop body
LE: loop exit
PB: predicated region body
PF: predicated region fallthrough
CT: control target
= control target key end

     0   :  { %9 = vsyncpa [#allocation3], 0  ;;  %s1934_s0 = inlined_call_operand.vmem [shape: bf16[2,2,10,18,4], index: 0, kind: input, shape index: {}]   ;;  %s1935_s1 = inlined_call_operand.vmem [shape: bf16[36,8], index: 1, kind: input, shape index: {}]   ;;  %s1936_s2 = inlined_call_operand.vmem [shape: f32[2,2,128,8], index: 2, kind: output, shape index: {0}]   ;;  %s1937_s3 = inlined_call_operand.hbm [shape: f32[2,2,2,8], index: 3, kind: output, shape index: {1}]  }
   0x1   :  { %11 = vsyncpa [#allocation3 + $0x1], 0  ;;  %s1396_s12 = smov 0   ;;  %s1398_s13 = smov 0  }
   0x2   :  { %s1400_s14 = smov 0   ;;  %s1402_s15 = smov 0  }
   0x3   :  { %s1404_s16 = smov 0   ;;  %s1406_s17 = smov 0  }
   0x4   :  { %s1408_s18 = smov 0   ;;  %s1410_s19 = smov 0  }
   0x5 LB: > { %s1099_s20 = sadd.s32 4294967295, %s1366_s19   ;;  %s1100_s21 = sadd.s32 4294967294, %s1366_s19   ;;  %s1366_s19 = sphi %s1410_s19, %s17_s19   ;;  %s1362_s18 = sphi %s1408_s18, %s1946_s18   ;;  %s1358_s17 = sphi %s1406_s17, %s1945_s17   ;;  %s1354_s16 = sphi %s1404_s16, %s1944_s16   ;;  %s1350_s15 = sphi %s1402_s15, %s1943_s15   ;;  %s1346_s14 = sphi %s1400_s14, %s1942_s14   ;;  %s1342_s13 = sphi %s1398_s13, %s1941_s13   ;;  %s1338_s12 = sphi %s1396_s12, %s1940_s12  }
   0x6   : > { %s26_s22 = sadd.s32 1, %s1358_s17  ;;  %s29_s23 = sadd.s32 1, %s1362_s18 }
   0x7   : > { %p27_p0 = scmp.ge.s32.totalorder %s26_s22, 2  ;;  %p125_p1 = scmp.ne.s32.totalorder %s1346_s14, %s1342_s13 }
   0x8   : > { %p126_p2 = scmp.eq.s32.totalorder %s1099_s20, 3  ;;  %p131_p5 = scmp.ne.s32.totalorder %s1342_s13, %s1338_s12 }
   0x9   : > { %s1948_s22 = smov (%p27_p0, %s26_s22), 0  ;;  %s1950_s23 = smov (!%p27_p0, %s29_s23), %s1362_s18 }
   0xa   : > { %s111_s24 = ssub.s32 %s1358_s17, %s1948_s22  ;;  %p1447_p3 = por %p126_p2, %p125_p1 }
   0xb   : > { %p31_p4 = scmp.ge.s32.totalorder %s1950_s23, 2  ;;  %p132_p6 = scmp.eq.s32.totalorder %s1100_s21, 3 }
   0xc   : > { %p1103_p7 = scmp.ge.s32.totalorder %s1366_s19, 1  ;;  %p165_p9 = scmp.lt.s32.totalorder %s1366_s19, 5 }
   0xd   : > { %s1952_s23 = smov (%p31_p4, %s1950_s23), 0  ;;  %p1456_p8 = por %p132_p6, %p131_p5 }
   0xe   : > { %s110_s27 = ssub.s32 %s1362_s18, %s1952_s23  ;;  %s115_s28 = sadd.s32 1, %s1346_s14 }
   0xf   : > { %s112_s29 = sor.u32 %s111_s24, %s110_s27  ;;  %p166_p10 = pnand %p1103_p7, %p165_p9 }
  0x10   : > { %p113_p11 = scmp.eq.s32.totalorder %s112_s29, 0  ;;  %p202_p12 = scmp.lt.s32.totalorder (!%p166_p10), %s1354_s16, 1 }
  0x11   : > { %169 = sbr.rel (%p166_p10) target bundleno = 483 (0x1e3), region = 28  ;;  %p204_p13 = scmp.lt.s32.totalorder (!%p166_p10), %s1350_s15, 1 }
  0x12   : > { %s1465_s30 = scalar_select %p113_p11, %s1346_s14, %s115_s28  }
  0x13   : > { %s1368_s21 = smov (!%p166_p10), 12   ;;  %s1369_s24 = smov (!%p166_p10), 24  }
  0x14   : > { %s1370_s27 = smov (!%p166_p10), 8   ;;  %s1371_s28 = smov (!%p166_p10), 32  }
  0x15   : > { %s1372_s29 = smov (!%p166_p10), 20  }
  0x16   : > { %s1470_s4 = scalar_select %p202_p12, %s1354_s16, 1  ;;  %vm428_vm0 = vcmask 1046528   ;;  %vm315_vm1 = vsmask.f32 7424  ;;  %vm784_vm2 = vcmask 1041408   ;;  %vm611_vm3 = vcmask 31744  }
  0x17   : > { %s1473_s5 = scalar_select %p204_p13, %s1350_s15, 1  ;;  %vm628_vm4 = vcmask 64512   ;;  %vm645_vm5 = vcmask 97280   ;;  %vm662_vm6 = vcmask 130048   ;;  %vm679_vm7 = vcmask 162816  }
  0x18   : > { %s1192_s6 = smul.u32 60, %s1470_s4  ;;  %vm696_vm8 = vcmask 195584   ;;  %vm713_vm9 = vcmask 228352   ;;  %vm730_vm10 = vcmask 261120   ;;  %vm767_vm11 = vcmask 293888  }
  0x19   : > { %s1191_s7 = smul.u32 30, %s1473_s5  ;;  %vm927_vm12 = vcmask 1040384   ;;  %vm929_vm13 = vcmask 58368  }
  0x1b   : > { %s208_s8 = sadd.s32 %s1192_s6, %s1191_s7  ;;  %s1373_s6 = smov 4  }
  0x1c   : > { %s1105_s9 = sshll.u32 %s208_s8, 2  ;;  %s1374_s7 = smov 16  }
  0x1d   : > { %s1480_s20 = scalar_lea.vmem %s1934_s0, %s1105_s9  ;;  %s1375_s8 = smov 28  }
  0x1e   : > { %v1483_v0 = vld [vmem:[%s1480_s20 + $0xc] sm:$0xff]  ;;  %v1486_v1 = vld [vmem:[%s1480_s20] sm:$0xff]  ;;  %v223_v2 = vld [vmem:[%s1480_s20 + $0x8] sm:$0x1] }
  0x1f   : > { %v299_v3 = vunpack.c.l.b16 %v223_v2  ;;  %v1490_v4 = vld [vmem:[%s1480_s20 + $0x18] sm:$0xff]  ;;  %v229_v5 = vld [vmem:[%s1480_s20 + $0x20] sm:$0x1]  ;;  %v226_v6 = vld [vmem:[%s1480_s20 + $0x14] sm:$0x1]  ;;  %474 = vrot.lane.b32.xlu1 %v1483_v0, %s1368_s21  ;;  %v319_v8 = vshll.u32 %v1486_v1, 16 }
  0x20   : > { %v301_v7 = vunpack.c.l.b16 %v229_v5  ;;  %v429_v10 = vrot.slane %v1486_v1, 1  ;;  %v300_v11 = vunpack.c.l.b16 %v226_v6  ;;  %545 = vrot.lane.b32.xlu2 %v1490_v4, %s1369_s24  ;;  %v435_v13 = vrot.slane %v1490_v4, 1  ;;  %v235_v20 = vld [vmem:[%s1480_s20 + $0x38] sm:$0x1]  ;;  %v1507_v26 = vld [vmem:[%s1480_s20 + $0x30] sm:$0xff]  ;;  %v1531_v48 = vld [vmem:[%s1480_s20 + $0x24] sm:$0xff] }
  0x21   : > { %v307_v9 = vpack.c.b16 %v299_v3, %v299_v3  ;;  %v317_v14 = vshrl.u32 %v1486_v1, 16  ;;  %v331_v15 = vshll.u32 %v1483_v0, 16  ;;  %v321_v17 = vrot.slane %v319_v8, 1  ;;  %v232_v42 = vld [vmem:[%s1480_s20 + $0x2c] sm:$0x1]  ;;  %v1548_v62 = vld [vmem:[%s1480_s20 + $0x3c] sm:$0xff] }
  0x22   : > { %v309_v12 = vpack.c.b16 %v301_v7, %v301_v7  ;;  %v308_v19 = vpack.c.b16 %v300_v11, %v300_v11  ;;  %v329_v23 = vshrl.u32 %v1483_v0, 16  ;;  %v343_v28 = vshll.u32 %v1490_v4, 16  ;;  %v238_v57 = vld [vmem:[%s1480_s20 + $0x44] sm:$0x1] }
  0x23   : > { %v430_v16 = vrot.slane %v307_v9, 1  ;;  %v324_v18 = vshll.u32 %v307_v9, 16  ;;  %v333_v24 = vrot.slane %v331_v15, 1  ;;  %v303_v29 = vunpack.c.l.b16 %v235_v20  ;;  %v1581_v20 = vld [vmem:[%s1480_s20 + $0x48] sm:$0xff] }
  0x24   : > { %v436_v21 = vrot.slane %v309_v12, 1  ;;  %v336_v25 = vshll.u32 %v308_v19, 16  ;;  %v322_v30 = vor.u32 %v321_v17, %v317_v14  ;;  %v432_v32 = vrot.slane %v1483_v0, 1 }
  0x25   : > { %v431_v22 = vsel %vm428_vm0, %v429_v10, %v430_v16  ;;  %v326_v31 = vrot.slane %v324_v18, 1  ;;  %v433_v33 = vrot.slane %v308_v19, 1  ;;  %v334_v34 = vor.u32 %v333_v24, %v329_v23  ;;  %v241_v19 = vld [vmem:[%s1480_s20 + $0x50] sm:$0x1] }
  0x26   : > { %453 = vrot.lane.b32.xlu0 %v431_v22, %s1370_s27  ;;  %v1511_v27 = vsel %vm428_vm0, %v435_v13, %v436_v21  ;;  %v338_v35 = vrot.slane %v336_v25, 1  ;;  %v311_v36 = vpack.c.b16 %v303_v29, %v303_v29  ;;  %v367_v37 = vshll.u32 %v1507_v26, 16 }
  0x27   : > { %595 = vrot.lane.b32.xlu1 %v1511_v27, %s1371_s28  ;;  %v341_v38 = vshrl.u32 %v1490_v4, 16  ;;  %v345_v39 = vrot.slane %v343_v28, 1  ;;  %v348_v40 = vshll.u32 %v309_v12, 16  ;;  %v1520_v41 = vsel %vm428_vm0, %v432_v32, %v433_v33 }
  0x28   : > { %v327_v43 = vsel %vm315_vm1, %v322_v30, %v326_v31  ;;  %524 = vrot.lane.b32.xlu2 %v1520_v41, %s1372_s29  ;;  %v365_v44 = vshrl.u32 %v1507_v26, 16  ;;  %v1528_v45 = vsel %vm315_vm1, %v334_v34, %v338_v35  ;;  %v369_v46 = vrot.slane %v367_v37, 1 }
  0x29   : > { %v372_v47 = vshll.u32 %v311_v36, 16  ;;  %v302_v49 = vunpack.c.l.b16 %v232_v42  ;;  %v346_v50 = vor.u32 %v345_v39, %v341_v38  ;;  %v350_v51 = vrot.slane %v348_v40, 1  ;;  %v244_v39 = vld [vmem:[%s1480_s20 + $0x5c] sm:$0x1]  ;;  %v1623_v42 = vld [vmem:[%s1480_s20 + $0x54] sm:$0xff] }
  0x2a   : > { %v370_v52 = vor.u32 %v369_v46, %v365_v44  ;;  %v355_v55 = vshll.u32 %v1531_v48, 16  ;;  %v353_v58 = vshrl.u32 %v1531_v48, 16  ;;  %v304_v63 = vunpack.c.l.b16 %v238_v57 }
  0x2b   : > { %v374_v53 = vrot.slane %v372_v47, 1  ;;  %v310_v54 = vpack.c.b16 %v302_v49, %v302_v49  ;;  %v1538_v56 = vsel %vm315_vm1, %v346_v50, %v350_v51  ;;  %v379_v6 = vshll.u32 %v1548_v62, 16 }
  0x2c   : > { %v357_v60 = vrot.slane %v355_v55, 1  ;;  %v312_v5 = vpack.c.b16 %v304_v63, %v304_v63  ;;  %v377_v8 = vshrl.u32 %v1548_v62, 16  ;;  %v441_v11 = vrot.slane %v1507_v26, 1  ;;  %v1653_v55 = vld [vmem:[%s1480_s20 + $0x60] sm:$0xff] }
  0x2d   : > { %v1545_v59 = vsel %vm315_vm1, %v370_v52, %v374_v53  ;;  %v360_v61 = vshll.u32 %v310_v54, 16  ;;  %v381_v9 = vrot.slane %v379_v6, 1  ;;  %v442_v12 = vrot.slane %v311_v36, 1 }
  0x2e   : > { %412 = vrot.lane.b32.xlu0 %v327_v43, %s1373_s6  ;;  %v358_v2 = vor.u32 %v357_v60, %v353_v58  ;;  %v384_v10 = vshll.u32 %v312_v5, 16  ;;  %v438_v17 = vrot.slane %v1531_v48, 1  ;;  %v439_v18 = vrot.slane %v310_v54, 1  ;;  %v247_v54 = vld [vmem:[%s1480_s20 + $0x68] sm:$0x1] }
  0x2f   : > { %505 = vrot.lane.b32.xlu1 %v1528_v45, %s1374_s7  ;;  %v362_v3 = vrot.slane %v360_v61, 1  ;;  %v382_v13 = vor.u32 %v381_v9, %v377_v8  ;;  %v1567_v15 = vsel %vm428_vm0, %v441_v11, %v442_v12  ;;  %v305_v21 = vunpack.c.l.b16 %v241_v19  ;;  %v1180_v12 = vld [vmem:[%s1935_s1] sm:$0xff] }
  0x30   : > { %416 = vrot.lane.b32.xlu2 %v1538_v56, %s1373_s6  ;;  %v386_v14 = vrot.slane %v384_v10, 1  ;;  %v1584_v22 = vsel %vm428_vm0, %v438_v17, %v439_v18  ;;  %v391_v23 = vshll.u32 %v1581_v20, 16  ;;  %v444_v25 = vrot.slane %v1548_v62, 1 }
  0x31   : > { %v1558_v7 = vsel %vm315_vm1, %v358_v2, %v362_v3  ;;  %v313_v24 = vpack.c.b16 %v305_v21, %v305_v21  ;;  %v445_v28 = vrot.slane %v312_v5, 1  ;;  %v389_v29 = vshrl.u32 %v1581_v20, 16  ;;  %v1181_v3 = vld [vmem:[%s1935_s1 + $0x8] sm:$0xff] }
  0x32   : > { %v1572_v16 = vsel %vm315_vm1, %v382_v13, %v386_v14  ;;  %v393_v30 = vrot.slane %v391_v23, 1  ;;  %v447_v36 = vrot.slane %v1581_v20, 1  ;;  %v306_v40 = vunpack.c.l.b16 %v244_v39 }
  0x33   : > { %v396_v31 = vshll.u32 %v313_v24, 16  ;;  %v1596_v32 = vsel %vm428_vm0, %v444_v25, %v445_v28  ;;  %v448_v37 = vrot.slane %v313_v24, 1  ;;  %v403_v44 = vshll.u32 %v1623_v42, 16 }
  0x34   : > { %v394_v33 = vor.u32 %v393_v30, %v389_v29  ;;  %v314_v43 = vpack.c.b16 %v306_v40, %v306_v40  ;;  %v450_v51 = vrot.slane %v1623_v42, 1  ;;  %v496_v63 = vshll.u32 %v1653_v55, 16  ;;  %v250_v40 = vld [vmem:[%s1480_s20 + $0x74] sm:$0x1] }
  0x35   : > { %v398_v34 = vrot.slane %v396_v31, 1  ;;  %v1611_v38 = vsel %vm428_vm0, %v447_v36, %v448_v37  ;;  %v405_v46 = vrot.slane %v403_v44, 1  ;;  %v494_v5 = vshrl.u32 %v1653_v55, 16 }
  0x36   : > { %576 = vrot.lane.b32.xlu0 %v1538_v56, %s1375_s8  ;;  %v408_v47 = vshll.u32 %v314_v43, 16  ;;  %v451_v52 = vrot.slane %v314_v43, 1  ;;  %v498_v6 = vrot.slane %v496_v63, 1  ;;  %v521_v9 = vrot.slane %v1653_v55, 1 }
  0x37   : > { %420 = vrot.lane.b32.xlu1 %v1545_v59, %s1373_s6  ;;  %v1605_v35 = vsel %vm315_vm1, %v394_v33, %v398_v34  ;;  %v562_v44 = vunpack.c.l.b16 %v250_v40 }
  0x38   : > { %478 = vrot.lane.b32.xlu2 %v1531_v48, %s1368_s21  ;;  %v410_v50 = vrot.slane %v408_v47, 1  ;;  %v1642_v53 = vsel %vm428_vm0, %v450_v51, %v451_v52  ;;  %v499_v13 = vor.u32 %v498_v6, %v494_v5 }
  0x3e   : > { %457 = vrot.lane.b32.xlu0 %v1511_v27, %s1370_s27 }
  0x3f   : > { %509 = vrot.lane.b32.xlu1 %v1558_v7, %s1374_s7 }
  0x40   : > { %482 = vrot.lane.b32.xlu2 %v1548_v62, %s1368_s21 }
  0x46   : > { %461 = vrot.lane.b32.xlu0 %v1567_v15, %s1370_s27 }
  0x47   : > { %513 = vrot.lane.b32.xlu1 %v1572_v16, %s1374_s7 }
  0x48   : > { %549 = vrot.lane.b32.xlu2 %v1507_v26, %s1369_s24 }
  0x4e   : > { %528 = vrot.lane.b32.xlu0 %v1584_v22, %s1372_s29 }
  0x4f   : > { %580 = vrot.lane.b32.xlu1 %v1545_v59, %s1375_s8 }
  0x50   : > { %553 = vrot.lane.b32.xlu2 %v1581_v20, %s1369_s24 }
  0x56   : > { %532 = vrot.lane.b32.xlu0 %v1596_v32, %s1372_s29 }
  0x57   : > { %414 = vrot.lane.b32.xlu1 %v1528_v45, %s1373_s6  ;;  %v401_v45 = vshrl.u32 %v1623_v42, 16 }
  0x58   : > { %584 = vrot.lane.b32.xlu2 %v1605_v35, %s1375_s8 }
  0x59   : > { %v406_v49 = vor.u32 %v405_v46, %v401_v45  ;;  %v1179_v45 = vld [vmem:[%s1480_s20 + $0x6c] sm:$0xff]  ;;  %s1106_s20 = sshll.u32 %s1473_s5, 4 }
  0x5e   : > { %599 = vrot.lane.b32.xlu0 %v1567_v15, %s1371_s28 }
  0x5f   : > { %603 = vrot.lane.b32.xlu1 %v1611_v38, %s1371_s28 }
  0x60   : > { %424 = vrot.lane.b32.xlu2 %v1605_v35, %s1373_s6 }
  0x66   : > { %455 = vrot.lane.b32.xlu0 %v1520_v41, %s1370_s27  ;;  %v1636_v41 = vsel %vm315_vm1, %v406_v49, %v410_v50  ;;  %v565_v49 = vshrl.u32 %v1179_v45, 16 }
  0x67   : > { %465 = vrot.lane.b32.xlu1 %v1611_v38, %s1370_s27 }
  0x68   : > { %507 = vrot.lane.b32.xlu2 %v1538_v56, %s1374_s7  ;;  %v491_v56 = vunpack.c.l.b16 %v247_v54 }
  0x6a   : > { %v492_v61 = vpack.c.b16 %v491_v56, %v491_v56 }
  0x6c   : > { %v501_v8 = vshll.u32 %v492_v61, 16  ;;  %v522_v10 = vrot.slane %v492_v61, 1 }
  0x6e   : > { %476 = vrot.lane.b32.xlu0 %v1490_v4, %s1368_s21  ;;  %v503_v14 = vrot.slane %v501_v8, 1 }
  0x6f   : > { %526 = vrot.lane.b32.xlu1 %v1511_v27, %s1372_s29  ;;  %v751_v27 = vld [vmem:[%s1935_s1 + $0x10] sm:$0x3] }
  0x70   : > { %517 = vrot.lane.b32.xlu2 %v1636_v41, %s1374_s7  ;;  %v761_v58 = vunpack.c.l.b16 %v751_v27  ;;  %v504_v17 = vsel %vm315_vm1, %v499_v13, %v503_v14 }
  0x72   : > { %v764_v60 = vpack.c.b16 %v761_v58, %v761_v58 }
  0x74   : > { %v786_v2 = vsel %vm784_vm2, %v764_v60, 0 }
  0x75   : > { %793 = vmatpush.bf16.msra.mxu0 %v786_v2  ;;  %1182 = vmatpush.bf16.msra.mxu1 %v786_v2 }
  0x76   : > { %486 = vrot.lane.b32.xlu0 %v1623_v42, %s1368_s21  ;;  %1183 = vmatpush.bf16.msra.mxu2 %v786_v2 }
  0x77   : > { %536 = vrot.lane.b32.xlu1 %v1642_v53, %s1372_s29  ;;  %1184 = vmatpush.bf16.msra.mxu3 %v786_v2 }
  0x78   : > { %578 = vrot.lane.b32.xlu2 %v1558_v7, %s1375_s8 }
  0x79   : > { %794 = vmatpush.bf16.msra.mxu0 %v1181_v3  ;;  %1185 = vmatpush.bf16.msra.mxu1 %v1181_v3 }
  0x7a   : > { %v1655_v57 = vpop.permute.xlu2 %545  ;;  %1186 = vmatpush.bf16.msra.mxu2 %v1181_v3 }
  0x7b   : > { %1187 = vmatpush.bf16.msra.mxu3 %v1181_v3 }
  0x7d   : > { %795 = vmatpush.bf16.msra.mxu0 %v1180_v12  ;;  %1188 = vmatpush.bf16.msra.mxu1 %v1180_v12 }
  0x7e   : > { %547 = vrot.lane.b32.xlu0 %v1531_v48, %s1369_s24  ;;  %1189 = vmatpush.bf16.msra.mxu2 %v1180_v12 }
  0x7f   : > { %597 = vrot.lane.b32.xlu1 %v1584_v22, %s1371_s28  ;;  %1190 = vmatpush.bf16.msra.mxu3 %v1180_v12 }
  0x80   : > { %418 = vrot.lane.b32.xlu2 %v1558_v7, %s1373_s6  ;;  %v1679_v7 = vsel %vm428_vm0, %v521_v9, %v522_v10 }
  0x82   : > { %v525_v11 = vpop.permute.xlu2 %524 }
  0x86   : > { %557 = vrot.lane.b32.xlu0 %v1653_v55, %s1369_s24 }
  0x87   : > { %459 = vrot.lane.b32.xlu1 %v1584_v22, %s1370_s27 }
  0x88   : > { %607 = vrot.lane.b32.xlu2 %v1679_v7, %s1371_s28 }
  0x8a   : > { %v1684_v18 = vpop.permute.xlu2 %416 }
  0x8e   : > { %588 = vrot.lane.b32.xlu0 %v504_v17, %s1375_s8 }
  0x8f   : > { %480 = vrot.lane.b32.xlu1 %v1507_v26, %s1368_s21 }
  0x90   : > { %463 = vrot.lane.b32.xlu2 %v1596_v32, %s1370_s27 }
  0x91   : > { %v475_v19 = vpop.permute.xlu1 %474 }
  0x92   : > { %v1691_v21 = vpop.permute.xlu2 %478 }
  0x96   : > { %422 = vrot.lane.b32.xlu0 %v1572_v16, %s1373_s6 }
  0x97   : > { %484 = vrot.lane.b32.xlu1 %v1581_v20, %s1368_s21 }
  0x98   : > { %v454_v22 = vpop.permute.xlu0 %453  ;;  %530 = vrot.lane.b32.xlu2 %v1567_v15, %s1372_s29 }
  0x99   : > { %v596_v23 = vpop.permute.xlu1 %595 }
  0x9a   : > { %v1701_v24 = vpop.permute.xlu2 %482 }
  0x9e   : > { %511 = vrot.lane.b32.xlu0 %v1545_v59, %s1374_s7 }
  0x9f   : > { %551 = vrot.lane.b32.xlu1 %v1548_v62, %s1369_s24 }
  0xa0   : > { %v413_v25 = vpop.permute.xlu0 %412  ;;  %534 = vrot.lane.b32.xlu2 %v1611_v38, %s1372_s29 }
  0xa1   : > { %v613_v28 = vsel %vm611_vm3, %v1486_v1, %v413_v25  ;;  %v506_v15 = vpop.permute.xlu1 %505 }
  0xa2   : > { %v630_v29 = vsel %vm628_vm4, %v613_v28, %v454_v22  ;;  %v550_v36 = vpop.permute.xlu2 %549 }
  0xa3   : > { %v647_v30 = vsel %vm645_vm5, %v630_v29, %v475_v19 }
  0xa4   : > { %v664_v59 = vsel %vm662_vm6, %v647_v30, %v506_v15 }
  0xa5   : > { %v681_v31 = vsel %vm679_vm7, %v664_v59, %v525_v11 }
  0xa6   : > { %515 = vrot.lane.b32.xlu0 %v1605_v35, %s1374_s7  ;;  %v698_v1 = vsel %vm696_vm8, %v681_v31, %v1655_v57 }
  0xa7   : > { %555 = vrot.lane.b32.xlu1 %v1623_v42, %s1369_s24 }
  0xa8   : > { %v577_v33 = vpop.permute.xlu0 %576  ;;  %601 = vrot.lane.b32.xlu2 %v1596_v32, %s1371_s28  ;;  %v567_v32 = vshll.u32 %v1179_v45, 16 }
  0xa9   : > { %v715_v34 = vsel %vm713_vm9, %v698_v1, %v577_v33  ;;  %v421_v37 = vpop.permute.xlu1 %420 }
  0xaa   : > { %v732_v38 = vsel %vm730_vm10, %v715_v34, %v596_v23  ;;  %v554_v43 = vpop.permute.xlu2 %553  ;;  %v569_v50 = vrot.slane %v567_v32, 1  ;;  %v621_v57 = vsel %vm611_vm3, %v1507_v26, %v421_v37 }
  0xab   : > { %1157 = vmatmul.msk.bf16.vlgmr.msra.gmra.mxu0 %vm767_vm11, %v732_v38 }
  0xac   : > { %v570_v54 = vor.u32 %v569_v50, %v565_v49 }
  0xae   : > { %582 = vrot.lane.b32.xlu0 %v1572_v16, %s1375_s8  ;;  %v563_v16 = vpack.c.b16 %v562_v44, %v562_v44 }
  0xaf   : > { %605 = vrot.lane.b32.xlu1 %v1642_v53, %s1371_s28 }
  0xb0   : > { %v458_v35 = vpop.permute.xlu0 %457  ;;  %426 = vrot.lane.b32.xlu2 %v1636_v41, %s1373_s6  ;;  %v572_v51 = vshll.u32 %v563_v16, 16  ;;  %v593_v2 = vrot.slane %v563_v16, 1  ;;  %s199_s6 = sand.u32 1, %s1342_s13  }
  0xb1   : > { %v510_v39 = vpop.permute.xlu1 %509 }
  0xb2   : > { %v585_v52 = vpop.permute.xlu2 %584  ;;  %v574_v27 = vrot.slane %v572_v51, 1 }
  0xb6   : > { %586 = vrot.lane.b32.xlu0 %v1636_v41, %s1375_s8  ;;  %v617_v41 = vsel %vm611_vm3, %v1490_v4, %v1684_v18  ;;  %v592_v4 = vrot.slane %v1179_v45, 1 }
  0xb7   : > { %488 = vrot.lane.b32.xlu1 %v1653_v55, %s1368_s21  ;;  %v575_v55 = vsel %vm315_vm1, %v570_v54, %v574_v27  ;;  %v634_v60 = vsel %vm628_vm4, %v617_v41, %v458_v35  ;;  %s1107_s21 = sshll.u32 %s1470_s4, 5 }
  0xb8   : > { %v462_v46 = vpop.permute.xlu0 %461  ;;  %519 = vrot.lane.b32.xlu2 %v504_v17, %s1374_s7  ;;  %v651_v63 = vsel %vm645_vm5, %v634_v60, %v1691_v21  ;;  %v594_v10 = vsel %vm428_vm0, %v592_v4, %v593_v2 }
  0xb9   : > { %v514_v47 = vpop.permute.xlu1 %513  ;;  %v638_v61 = vsel %vm628_vm4, %v621_v57, %v462_v46  ;;  %v668_v5 = vsel %vm662_vm6, %v651_v63, %v510_v39 }
  0xba   : > { %v655_v3 = vsel %vm645_vm5, %v638_v61, %v1701_v24 }
  0xbb   : > { %v672_v9 = vsel %vm662_vm6, %v655_v3, %v514_v47 }
  0xbe   : > { %467 = vrot.lane.b32.xlu0 %v1642_v53, %s1370_s27  ;;  %v425_v53 = vpop.permute.xlu2 %424 }
  0xbf   : > { %559 = vrot.lane.b32.xlu1 %v1179_v45, %s1369_s24  ;;  %s217_s24 = sadd.s32 %s1107_s21, %s1106_s20 }
  0xc0   : > { %v529_v56 = vpop.permute.xlu0 %528  ;;  %590 = vrot.lane.b32.xlu2 %v575_v55, %s1375_s8  ;;  %s1108_s27 = sshll.u32 %s217_s24, 3  ;;  %s1104_s8 = sshll.u32 %s199_s6, 1 }
  0xc1   : > { %v581_v58 = vpop.permute.xlu1 %580  ;;  %v685_v6 = vsel %vm679_vm7, %v668_v5, %v529_v56 }
  0xc2   : > { %v702_v12 = vsel %vm696_vm8, %v685_v6, %v550_v36 }
  0xc6   : > { %538 = vrot.lane.b32.xlu0 %v1679_v7, %s1372_s29  ;;  %v508_v14 = vpop.permute.xlu2 %507  ;;  %v719_v7 = vsel %vm713_vm9, %v702_v12, %v581_v58  ;;  %s1166_s29 = sshll.u32 %s1354_s16, 1  ;;  %s201_s16 = scalar_lea.vmem [#allocation2], %s1104_s8 }
  0xc7   : > { %s970_s7 = sadd.s32 %s1350_s15, %s1166_s29  ;;  %s974_s21 = sshll.u32 %s201_s16, 4  ;;  %s975_s21 = int_to_ptr.vmem [resolvable:$true] %s974_s21 }
  0xc8   : > { %v533_v26 = vpop.permute.xlu0 %532  ;;  %s1167_s9 = sshll.u32 %s970_s7, 1  ;;  %s957_s15 = scalar_lea.sflag [#allocation3], %s199_s6 }
  0xc9   : > { %v415_v8 = vpop.permute.xlu1 %414  ;;  %v689_v11 = vsel %vm679_vm7, %v672_v9, %v533_v26  ;;  %s972_s20 = scalar_lea.hbm %s1937_s3, %s1167_s9  ;;  %s1292_s29 = scalar_lea.hbm %s1937_s3, 8 }
  0xca   : > { %v706_v13 = vsel %vm696_vm8, %v689_v11, %v554_v43  ;;  %v615_v30 = vsel %vm611_vm3, %v1483_v0, %v415_v8  ;;  %v625_v0 = vsel %vm611_vm3, %v1581_v20, %v425_v53  ;;  %s976_s24 = sshll.u32 %s972_s20, 4  ;;  %s977_s24 = int_to_ptr.hbm [resolvable:$true] %s976_s24 }
  0xcb   : > { %v723_v19 = vsel %vm713_vm9, %v706_v13, %v585_v52 }
  0xce   : > { %609 = vrot.lane.b32.xlu0 %v594_v10, %s1371_s28  ;;  %v518_v24 = vpop.permute.xlu2 %517  ;;  %s1810_s28 = scalar_lea.vmem %s1936_s2, %s1108_s27  ;;  %s1286_s27 = sshra.s32 %s977_s24, 4  ;;  %s1287_s27 = int_to_ptr.hbm [resolvable:$true] %s1286_s27 }
  0xcf   : > { %s1288_s4 = scalar_lea.hbm %s1287_s27, 2  ;;  %p1293_p4 = scmp.lt.s32.totalorder %s1287_s27, %s1937_s3 }
  0xd0   : > { %v600_v17 = vpop.permute.xlu0 %599  ;;  %p1289_p0 = scmp.ne.s32.totalorder %s1287_s27, %s1288_s4  ;;  %p1294_p5 = scmp.lt.s32.totalorder %s1292_s29, %s1288_s4 }
  0xd1   : > { %v736_v18 = vsel %vm730_vm10, %v719_v7, %v600_v17  ;;  %v604_v21 = vpop.permute.xlu1 %603 }
  0xd2   : > { %1159 = vmatmul.msk.bf16.vlgmr.msra.gmra.mxu1 %vm767_vm11, %v736_v18  ;;  %v740_v22 = vsel %vm730_vm10, %v723_v19, %v604_v21  ;;  %p1290_p1 = pnand %p1289_p0, %p1447_p3  ;;  %p1295_p6 = por %p1294_p5, %p1293_p4 }
  0xd3   : > { %1161 = vmatmul.msk.bf16.vlgmr.msra.gmra.mxu2 %vm767_vm11, %v740_v22 }
  0xd4   : > { %p1291_p2 = pneg %p1290_p1 }
  0xd6   : > { %v579_v15 = vpop.permute.xlu2 %578  ;;  %p1296_p7 = pnand %p1295_p6, %p1291_p2 }
  0xd8   : > { %v456_v23 = vpop.permute.xlu0 %455 }
  0xd9   : > { %v466_v25 = vpop.permute.xlu1 %465  ;;  %v632_v31 = vsel %vm628_vm4, %v615_v30, %v456_v23 }
  0xda   : > { %v642_v45 = vsel %vm628_vm4, %v625_v0, %v466_v25 }
  0xde   : > { %v419_v36 = vpop.permute.xlu2 %418 }
  0xdf   : > { %v619_v58 = vsel %vm611_vm3, %v1531_v48, %v419_v36 }
  0xe0   : > { %v477_v28 = vpop.permute.xlu0 %476 }
  0xe1   : > { %v527_v29 = vpop.permute.xlu1 %526  ;;  %v649_v1 = vsel %vm645_vm5, %v632_v31, %v477_v28 }
  0xe2   : > { %v666_v34 = vsel %vm662_vm6, %v649_v1, %v508_v14 }
  0xe3   : > { %v683_v37 = vsel %vm679_vm7, %v666_v34, %v527_v29 }
  0xe6   : > { %v608_v44 = vpop.permute.xlu2 %607 }
  0xe8   : > { %v487_v59 = vpop.permute.xlu0 %486 }
  0xe9   : > { %v537_v33 = vpop.permute.xlu1 %536  ;;  %v659_v16 = vsel %vm645_vm5, %v642_v45, %v487_v59 }
  0xea   : > { %v676_v47 = vsel %vm662_vm6, %v659_v16, %v518_v24 }
  0xeb   : > { %v693_v49 = vsel %vm679_vm7, %v676_v47, %v537_v33 }
  0xee   : > { %v464_v54 = vpop.permute.xlu2 %463 }
  0xf0   : > { %v548_v38 = vpop.permute.xlu0 %547 }
  0xf1   : > { %v700_v35 = vsel %vm696_vm8, %v683_v37, %v548_v38  ;;  %v598_v40 = vpop.permute.xlu1 %597 }
  0xf2   : > { %v717_v39 = vsel %vm713_vm9, %v700_v35, %v579_v15 }
  0xf3   : > { %v734_v43 = vsel %vm730_vm10, %v717_v39, %v598_v40 }
  0xf4   : > { %1158 = vmatmul.msk.bf16.gmra.mxu0 %vm767_vm11, %v734_v43 }
  0xf6   : > { %v531_v55 = vpop.permute.xlu2 %530 }
  0xf8   : > { %v558_v46 = vpop.permute.xlu0 %557 }
  0xf9   : > { %v460_v32 = vpop.permute.xlu1 %459  ;;  %v710_v50 = vsel %vm696_vm8, %v693_v49, %v558_v46 }
  0xfa   : > { %v636_v53 = vsel %vm628_vm4, %v619_v58, %v460_v32 }
  0xfe   : > { %v535_v61 = vpop.permute.xlu2 %534 }
 0x100   : > { %v589_v51 = vpop.permute.xlu0 %588 }
 0x101   : > { %v727_v52 = vsel %vm713_vm9, %v710_v50, %v589_v51  ;;  %v481_v27 = vpop.permute.xlu1 %480 }
 0x102   : > { %v744_v20 = vsel %vm730_vm10, %v727_v52, %v608_v44  ;;  %v653_v4 = vsel %vm645_vm5, %v636_v53, %v481_v27 }
 0x103   : > { %1163 = vmatmul.msk.bf16.vlgmr.msra.gmra.mxu3 %vm767_vm11, %v744_v20 }
 0x106   : > { %v602_v48 = vpop.permute.xlu2 %601 }
 0x108   : > { %v423_v41 = vpop.permute.xlu0 %422 }
 0x109   : > { %v485_v56 = vpop.permute.xlu1 %484  ;;  %v623_v3 = vsel %vm611_vm3, %v1548_v62, %v423_v41 }
 0x10a   : > { %v640_v6 = vsel %vm628_vm4, %v623_v3, %v464_v54 }
 0x10b   : > { %v657_v10 = vsel %vm645_vm5, %v640_v6, %v485_v56 }
 0x10e   : > { %v427_v21 = vpop.permute.xlu2 %426 }
 0x10f   : > { %v627_v25 = vsel %vm611_vm3, %v1623_v42, %v427_v21 }
 0x110   : > { %v512_v57 = vpop.permute.xlu0 %511 }
 0x111   : > { %v552_v60 = vpop.permute.xlu1 %551  ;;  %v670_v2 = vsel %vm662_vm6, %v653_v4, %v512_v57 }
 0x112   : > { %v687_v26 = vsel %vm679_vm7, %v670_v2, %v531_v55 }
 0x113   : > { %v704_v8 = vsel %vm696_vm8, %v687_v26, %v552_v60 }
 0x116   : > { %v520_v36 = vpop.permute.xlu2 %519 }
 0x118   : > { %v516_v63 = vpop.permute.xlu0 %515 }
 0x119   : > { %v556_v5 = vpop.permute.xlu1 %555  ;;  %v674_v12 = vsel %vm662_vm6, %v657_v10, %v516_v63 }
 0x11a   : > { %v691_v13 = vsel %vm679_vm7, %v674_v12, %v535_v61 }
 0x11b   : > { %v708_v7 = vsel %vm696_vm8, %v691_v13, %v556_v5 }
 0x11e   : > { %v591_v0 = vpop.permute.xlu2 %590 }
 0x120   : > { %v583_v9 = vpop.permute.xlu0 %582 }
 0x121   : > { %v721_v11 = vsel %vm713_vm9, %v704_v8, %v583_v9  ;;  %v606_v14 = vpop.permute.xlu1 %605 }
 0x122   : > { %v738_v62 = vsel %vm730_vm10, %v721_v11, %v602_v48 }
 0x123   : > { %1160 = vmatmul.msk.bf16.gmra.mxu1 %vm767_vm11, %v738_v62 }
 0x128   : > { %v797_v17 = vpop.f32.mrf.mxu0  ;;  %v587_v18 = vpop.permute.xlu0 %586 }
 0x129   : > { %931 = vst.msk [vmem:[%s1810_s28] sm:$0xff] %vm628_vm4, %v797_v17  ;;  %v725_v19 = vsel %vm713_vm9, %v708_v7, %v587_v18  ;;  %v874_v23 = vmul.f32 %v797_v17, %v797_v17  ;;  %v489_v24 = vpop.permute.xlu1 %488  ;;  %v837_v15 = vsel %vm628_vm4, %v797_v17, 0.0 }
 0x12a   : > { %v742_v22 = vsel %vm730_vm10, %v725_v19, %v606_v14 }
 0x12b   : > { %1162 = vmatmul.msk.bf16.gmra.mxu2 %vm767_vm11, %v742_v22  ;;  %v890_v1 = vsel %vm628_vm4, %v874_v23, 0.0 }
 0x130   : > { %v799_v28 = vpop.f32.mrf.mxu0  ;;  %v468_v29 = vpop.permute.xlu0 %467 }
 0x131   : > { %v838_v30 = vsel %vm628_vm4, %v799_v28, 0.0  ;;  %v875_v59 = vmul.f32 %v799_v28, %v799_v28  ;;  %932 = vst.msk [vmem:[%s1810_s28 + $0x8] sm:$0xff] %vm628_vm4, %v799_v28  ;;  %v644_v34 = vsel %vm628_vm4, %v627_v25, %v468_v29  ;;  %v560_v40 = vpop.permute.xlu1 %559 }
 0x132   : > { %v839_v31 = vadd.f32 %v838_v30, %v837_v15  ;;  %v661_v42 = vsel %vm645_vm5, %v644_v34, %v489_v24 }
 0x133   : > { %v891_v33 = vsel %vm628_vm4, %v875_v59, 0.0  ;;  %v678_v35 = vsel %vm662_vm6, %v661_v42, %v520_v36 }
 0x134   : > { %v892_v37 = vadd.f32 %v891_v33, %v890_v1 }
 0x138   : > { %v539_v38 = vpop.permute.xlu0 %538 }
 0x139   : > { %v695_v39 = vsel %vm679_vm7, %v678_v35, %v539_v38 }
 0x13a   : > { %v712_v43 = vsel %vm696_vm8, %v695_v39, %v560_v40 }
 0x13b   : > { %v729_v44 = vsel %vm713_vm9, %v712_v43, %v591_v0 }
 0x140   : > { %v610_v45 = vpop.permute.xlu0 %609 }
 0x141   : > { %v746_v46 = vsel %vm730_vm10, %v729_v44, %v610_v45 }
 0x142   : > { %1164 = vmatmul.msk.bf16.gmra.mxu3 %vm767_vm11, %v746_v46 }
 0x14f   : > { %v807_v16 = vpop.f32.mrf.mxu1 }
 0x150   : > { %935 = vst.msk [vmem:[%s1810_s28 + $0x20] sm:$0xff] %vm628_vm4, %v807_v16  ;;  %v878_v56 = vmul.f32 %v807_v16, %v807_v16  ;;  %v844_v60 = vsel %vm628_vm4, %v807_v16, 0.0 }
 0x152   : > { %v897_v4 = vsel %vm628_vm4, %v878_v56, 0.0 }
 0x156   : > { %v817_v47 = vpop.f32.mrf.mxu2 }
 0x157   : > { %v809_v32 = vpop.f32.mrf.mxu1  ;;  %939 = vst.msk [vmem:[%s1810_s28 + $0x40] sm:$0xff] %vm628_vm4, %v817_v47  ;;  %v882_v7 = vmul.f32 %v817_v47, %v817_v47  ;;  %v852_v22 = vsel %vm628_vm4, %v817_v47, 0.0 }
 0x158   : > { %936 = vst.msk [vmem:[%s1810_s28 + $0x28] sm:$0xff] %vm628_vm4, %v809_v32  ;;  %v879_v6 = vmul.f32 %v809_v32, %v809_v32  ;;  %v846_v8 = vsel %vm628_vm4, %v809_v32, 0.0 }
 0x159   : > { %v905_v28 = vsel %vm628_vm4, %v882_v7, 0.0 }
 0x15a   : > { %v899_v11 = vsel %vm628_vm4, %v879_v6, 0.0 }
 0x15e   : > { %v819_v49 = vpop.f32.mrf.mxu2 }
 0x15f   : > { %940 = vst.msk [vmem:[%s1810_s28 + $0x48] sm:$0xff] %vm628_vm4, %v819_v49  ;;  %v883_v30 = vmul.f32 %v819_v49, %v819_v49  ;;  %v854_v59 = vsel %vm628_vm4, %v819_v49, 0.0 }
 0x161   : > { %v907_v33 = vsel %vm628_vm4, %v883_v30, 0.0 }
 0x171   : > { %v802_v50 = vpop.f32.mrf.mxu0 }
 0x172   : > { %v840_v51 = vsel %vm628_vm4, %v802_v50, 0.0  ;;  %v876_v52 = vmul.f32 %v802_v50, %v802_v50  ;;  %933 = vst.msk [vmem:[%s1810_s28 + $0x10] sm:$0xff] %vm628_vm4, %v802_v50 }
 0x173   : > { %v841_v54 = vadd.f32 %v840_v51, %v839_v31 }
 0x174   : > { %v893_v27 = vsel %vm628_vm4, %v876_v52, 0.0 }
 0x175   : > { %v894_v20 = vadd.f32 %v893_v27, %v892_v37 }
 0x179   : > { %v804_v41 = vpop.f32.mrf.mxu0 }
 0x17a   : > { %v842_v55 = vsel %vm628_vm4, %v804_v41, 0.0  ;;  %v877_v57 = vmul.f32 %v804_v41, %v804_v41  ;;  %934 = vst.msk [vmem:[%s1810_s28 + $0x18] sm:$0xff] %vm628_vm4, %v804_v41 }
 0x17b   : > { %v843_v58 = vadd.f32 %v842_v55, %v841_v54 }
 0x17c   : > { %v895_v61 = vsel %vm628_vm4, %v877_v57, 0.0 }
 0x17d   : > { %v845_v53 = vadd.f32 %v844_v60, %v843_v58  ;;  %v896_v63 = vadd.f32 %v895_v61, %v894_v20 }
 0x17f   : > { %v898_v2 = vadd.f32 %v897_v4, %v896_v63  ;;  %v847_v10 = vadd.f32 %v846_v8, %v845_v53 }
 0x181   : > { %v900_v13 = vadd.f32 %v899_v11, %v898_v2 }
 0x186   : > { %v827_v3 = vpop.f32.mrf.mxu3 }
 0x187   : > { %943 = vst.msk [vmem:[%s1810_s28 + $0x60] sm:$0xff] %vm628_vm4, %v827_v3  ;;  %v886_v35 = vmul.f32 %v827_v3, %v827_v3  ;;  %v860_v44 = vsel %vm628_vm4, %v827_v3, 0.0 }
 0x189   : > { %v913_v32 = vsel %vm628_vm4, %v886_v35, 0.0 }
 0x18e   : > { %v829_v26 = vpop.f32.mrf.mxu3 }
 0x18f   : > { %944 = vst.msk [vmem:[%s1810_s28 + $0x68] sm:$0xff] %vm628_vm4, %v829_v26  ;;  %v887_v50 = vmul.f32 %v829_v26, %v829_v26  ;;  %v862_v52 = vsel %vm628_vm4, %v829_v26, 0.0 }
 0x191   : > { %v915_v20 = vsel %vm628_vm4, %v887_v50, 0.0 }
 0x1a0   : > { %v812_v5 = vpop.f32.mrf.mxu1 }
 0x1a1   : > { %937 = vst.msk [vmem:[%s1810_s28 + $0x30] sm:$0xff] %vm628_vm4, %v812_v5  ;;  %v880_v48 = vmul.f32 %v812_v5, %v812_v5  ;;  %v848_v9 = vsel %vm628_vm4, %v812_v5, 0.0 }
 0x1a2   : > { %v849_v62 = vadd.f32 %v848_v9, %v847_v10 }
 0x1a3   : > { %v901_v12 = vsel %vm628_vm4, %v880_v48, 0.0 }
 0x1a4   : > { %v902_v19 = vadd.f32 %v901_v12, %v900_v13 }
 0x1a8   : > { %v814_v14 = vpop.f32.mrf.mxu1 }
 0x1a9   : > { %v850_v17 = vsel %vm628_vm4, %v814_v14, 0.0  ;;  %v881_v18 = vmul.f32 %v814_v14, %v814_v14  ;;  %938 = vst.msk [vmem:[%s1810_s28 + $0x38] sm:$0xff] %vm628_vm4, %v814_v14 }
 0x1aa   : > { %v851_v21 = vadd.f32 %v850_v17, %v849_v62 }
 0x1ab   : > { %v903_v23 = vsel %vm628_vm4, %v881_v18, 0.0 }
 0x1ac   : > { %v853_v24 = vadd.f32 %v852_v22, %v851_v21  ;;  %v904_v25 = vadd.f32 %v903_v23, %v902_v19 }
 0x1ae   : > { %v906_v29 = vadd.f32 %v905_v28, %v904_v25  ;;  %v822_v15 = vpop.f32.mrf.mxu2  ;;  %v855_v1 = vadd.f32 %v854_v59, %v853_v24 }
 0x1af   : > { %941 = vst.msk [vmem:[%s1810_s28 + $0x50] sm:$0xff] %vm628_vm4, %v822_v15  ;;  %v884_v31 = vmul.f32 %v822_v15, %v822_v15  ;;  %v856_v34 = vsel %vm628_vm4, %v822_v15, 0.0 }
 0x1b0   : > { %v908_v36 = vadd.f32 %v907_v33, %v906_v29  ;;  %v857_v42 = vadd.f32 %v856_v34, %v855_v1 }
 0x1b1   : > { %v909_v37 = vsel %vm628_vm4, %v884_v31, 0.0 }
 0x1b2   : > { %v910_v43 = vadd.f32 %v909_v37, %v908_v36 }
 0x1b6   : > { %v824_v38 = vpop.f32.mrf.mxu2 }
 0x1b7   : > { %v858_v39 = vsel %vm628_vm4, %v824_v38, 0.0  ;;  %v885_v40 = vmul.f32 %v824_v38, %v824_v38  ;;  %942 = vst.msk [vmem:[%s1810_s28 + $0x58] sm:$0xff] %vm628_vm4, %v824_v38 }
 0x1b8   : > { %v859_v0 = vadd.f32 %v858_v39, %v857_v42 }
 0x1b9   : > { %v911_v45 = vsel %vm628_vm4, %v885_v40, 0.0 }
 0x1ba   : > { %v861_v46 = vadd.f32 %v860_v44, %v859_v0  ;;  %v912_v16 = vadd.f32 %v911_v45, %v910_v43 }
 0x1bc   : > { %v914_v47 = vadd.f32 %v913_v32, %v912_v16  ;;  %v863_v27 = vadd.f32 %v862_v52, %v861_v46 }
 0x1be   : > { %v916_v55 = vadd.f32 %v915_v20, %v914_v47 }
 0x1c5   : > { %v832_v49 = vpop.f32.mrf.mxu3 }
 0x1c6   : > { %945 = vst.msk [vmem:[%s1810_s28 + $0x70] sm:$0xff] %vm628_vm4, %v832_v49  ;;  %v888_v51 = vmul.f32 %v832_v49, %v832_v49  ;;  %v864_v54 = vsel %vm628_vm4, %v832_v49, 0.0 }
 0x1c7   : > { %v865_v56 = vadd.f32 %v864_v54, %v863_v27 }
 0x1c8   : > { %v917_v41 = vsel %vm628_vm4, %v888_v51, 0.0 }
 0x1c9   : > { %v918_v61 = vadd.f32 %v917_v41, %v916_v55 }
 0x1cd   : > { %v834_v57 = vpop.f32.mrf.mxu3 }
 0x1ce   : > { %v866_v58 = vsel %vm628_vm4, %v834_v57, 0.0  ;;  %v889_v60 = vmul.f32 %v834_v57, %v834_v57  ;;  %946 = vst.msk [vmem:[%s1810_s28 + $0x78] sm:$0xff] %vm628_vm4, %v834_v57 }
 0x1cf   : > { %v867_v53 = vadd.f32 %v866_v58, %v865_v56 }
 0x1d0   : > { %v919_v63 = vsel %vm628_vm4, %v889_v60, 0.0 }
 0x1d1   : > { %v868_v4 = vrot.slane %v867_v53, 4  ;;  %v920_v2 = vadd.f32 %v919_v63, %v918_v61 }
 0x1d3   : > { %v869_v3 = vadd.f32 %v868_v4, %v867_v53  ;;  %v921_v26 = vrot.slane %v920_v2, 4 }
 0x1d5   : > { %v870_v5 = vrot.slane %v869_v3, 2  ;;  %v922_v6 = vadd.f32 %v921_v26, %v920_v2 }
 0x1d7   : > { %v871_v48 = vadd.f32 %v870_v5, %v869_v3  ;;  %v923_v8 = vrot.slane %v922_v6, 2 }
 0x1d9   : > { %v872_v9 = vrot.slane %v871_v48, 1  ;;  %v924_v10 = vadd.f32 %v923_v8, %v922_v6 }
 0x1db   : > { %v925_v11 = vrot.slane %v924_v10, 1  ;;  %v873_v12 = vadd.f32 %v872_v9, %v871_v48 }
 0x1dd   : > { %v926_v62 = vadd.f32 %v925_v11, %v924_v10 }
 0x1df   : > { %v928_v13 = vsel %vm927_vm12, %v873_v12, %v926_v62 }
 0x1e0   : > { %930 = vst.msk [vmem:[%s201_s16] sm:$0x3] %vm929_vm13, %v928_v13 }
 0x1e1   : > { %1299 = shalt.err (!%p1296_p7)
}
 0x1e2   : > { %1193 = dma.vmem_to_hbm [thread:$0]  (%p1447_p3), %s975_s21, 32, %s977_s24, %s957_s15  }
 0x1e3 PF: > { %p1199_p9 = scmp.ge.s32.totalorder %s1366_s19, 2  ;;  %s1000_s6 = sand.u32 1, %s1338_s12  }
 0x1e4   : > { %s1001_s9 = scalar_lea.sflag [#allocation3], %s1000_s6 }
 0x1e5   : > { %p1196_p10 = pnand %p1199_p9, %p1456_p8 }
 0x1e7   : > { %p1197_p11 = pneg %p1196_p10 }
 0x1e9   : > { %1333 = dma.done.wait (%p1197_p11), %s1001_s9, 32  }
 0x1ea   : > { %1335 = vsyncadd (%p1197_p11), %s1001_s9, 4294967264  ;;  %s17_s19 = sadd.s32 1, %s1366_s19   ;;  %s1940_s12 = smov %s1342_s13 }
 0x1eb   : > { %p14_p12 = scmp.ge.s32.totalorder %s17_s19, 6   ;;  %s1941_s13 = smov %s1346_s14 }
 0x1ec   : > { %s1942_s14 = smov %s1465_s30  ;;  %s1943_s15 = smov %s1358_s17 }
 0x1ed   : > { %s1944_s16 = smov %s1362_s18  ;;  %s1945_s17 = smov %s1948_s22 }
 0x1ee   : > { %s1946_s18 = smov %s1952_s23  ;;  %16 = sbr.rel (!%p14_p12) target bundleno = 5 (0x5), region = 75 }
 0x1f3   :  { %1007 = vsyncpa [#allocation3], 1 }
 0x1f4   :  { %1009 = vsyncpa [#allocation3 + $0x1], 1 }

</bundles_post_ra>
